<compile_context>
chip_gen: v7x
topology: tpu7x:2x2x1
jax: 0.10.0
libtpu: 0.0.40
codegen_flags: <defaults>
</compile_context>

<pallas_src>
import functools

import jax
import jax.numpy as jnp
from jax.experimental import pallas as pl
from jax.experimental.pallas import tpu as pltpu


# A @ B^T dimension numbers (contract lhs dim 1 against rhs dim 1).
_NT_DIMS = (((1,), (1,)), ((), ()))


def _coord_att_kernel(x_ref, eh_ref, ew_ref,
                      w1_ref, sh1_ref, w2_ref, b2_ref, w3_ref, b3_ref,
                      o_ref, *, inv_w, inv_h):
    """One grid step over `rows = nb*C` batch-packed channel rows.

    x_ref : (rows, HW) f32        eh_ref: (H, HW) bf16 0/1   ew_ref: (W, HW) bf16 0/1
    w1_ref: (nb*mip, rows) f32    sh1_ref: (nb*mip, 1) f32
    w2_ref/w3_ref: (rows, nb*mip) f32    b2_ref/b3_ref: (rows, 1) f32
    """
    x = x_ref[...]                                     # (rows, HW) f32
    xb = x.astype(jnp.bfloat16)                        # MXU runs bf16 anyway

    # --- pool over W / pool over H: NT matmuls against the 0/1 expansion
    #     matrices (reused, no separate pooling constant); exact 1/W, 1/H
    #     scaling in f32 afterwards. ---
    pooled_h = jax.lax.dot_general(xb, eh_ref[...], _NT_DIMS,
                                   preferred_element_type=jnp.float32) * inv_w   # (rows, H)
    pooled_w = jax.lax.dot_general(xb, ew_ref[...], _NT_DIMS,
                                   preferred_element_type=jnp.float32) * inv_h   # (rows, W)

    # --- conv1 (1x1, BN1 scale folded into weight) + BN shift + h_swish.
    #     conv1/bn/h_swish act per spatial position, so the H and W halves
    #     never need to be concatenated. ---
    t_h = jnp.dot(w1_ref[...], pooled_h,
                  preferred_element_type=jnp.float32) + sh1_ref[...]             # (nb*mip, H)
    t_w = jnp.dot(w1_ref[...], pooled_w,
                  preferred_element_type=jnp.float32) + sh1_ref[...]             # (nb*mip, W)
    t_h = t_h * (jnp.clip(t_h + 3.0, 0.0, 6.0) * (1.0 / 6.0))                    # h_swish
    t_w = t_w * (jnp.clip(t_w + 3.0, 0.0, 6.0) * (1.0 / 6.0))

    # --- conv2 / conv3 (1x1) + sigmoid (exp + approx reciprocal -> EUP). ---
    a_h = jnp.dot(w2_ref[...], t_h,
                  preferred_element_type=jnp.float32) + b2_ref[...]              # (rows, H)
    a_w = jnp.dot(w3_ref[...], t_w,
                  preferred_element_type=jnp.float32) + b3_ref[...]              # (rows, W)
    a_h = pl.reciprocal(1.0 + jnp.exp(-a_h), approx=True)
    a_w = pl.reciprocal(1.0 + jnp.exp(-a_w), approx=True)

    # --- broadcast the 1-D attentions over the flattened plane via the 0/1
    #     expansion matmuls (stays lane-dense; unmasked output stores). ---
    ah_full = jnp.dot(a_h.astype(jnp.bfloat16), eh_ref[...],
                      preferred_element_type=jnp.float32)                        # (rows, HW)
    aw_full = jnp.dot(a_w.astype(jnp.bfloat16), ew_ref[...],
                      preferred_element_type=jnp.float32)                        # (rows, HW)

    o_ref[...] = x * ah_full * aw_full


def _expand_matrices(H, W, dtype=jnp.bfloat16):
    """0/1 row/column indicator matrices (exact in bf16)."""
    hw = H * W
    row = jnp.arange(hw) // W
    col = jnp.arange(hw) % W
    eh = (jnp.arange(H)[:, None] == row[None, :]).astype(dtype)      # (H, HW)
    ew = (jnp.arange(W)[:, None] == col[None, :]).astype(dtype)      # (W, HW)
    return eh, ew


def _block_diag(w, nb):
    """Host-side block-diagonal replication of a small 2-D weight."""
    if nb == 1:
        return w
    m, c = w.shape
    out = jnp.zeros((nb * m, nb * c), w.dtype)
    for i in range(nb):
        out = out.at[i * m:(i + 1) * m, i * c:(i + 1) * c].set(w)
    return out


def _coord_att_impl(x_nchw, params, *, nb, single_buffer_consts):
    N, C, H, W = x_nchw.shape
    HW = H * W
    mip = params["w1"].shape[0]
    rows = nb * C

    x2d = x_nchw.reshape(N * C, HW)

    eh, ew = _expand_matrices(H, W)                                   # bf16 0/1

    # Fold BN1 scale into conv1 weight; replicate weights block-diagonally so
    # nb batch elements share one set of 2-D matmuls per grid step.
    w1s = params["s1"] * params["w1"]                                 # (mip, C)
    w1_blk = _block_diag(w1s, nb)                                     # (nb*mip, rows)
    w2_blk = _block_diag(params["w2"], nb)                            # (rows, nb*mip)
    w3_blk = _block_diag(params["w3"], nb)
    sh1 = jnp.tile(params["sh1"], (nb, 1))                            # (nb*mip, 1)
    b2 = jnp.tile(params["b2"], (nb, 1))                              # (rows, 1)
    b3 = jnp.tile(params["b3"], (nb, 1))

    consts = [eh, ew, w1_blk, sh1, w2_blk, b2, w3_blk, b3]

    def const_spec(arr):
        # Constants never change across the grid; single-buffer them so the
        # pipeline does not waste a second VMEM copy (matters at prod H*W).
        if single_buffer_consts:
            return pl.BlockSpec(arr.shape, lambda g: (0, 0),
                                pipeline_mode=pl.Buffered(1))
        return pl.BlockSpec(arr.shape, lambda g: (0, 0))

    in_specs = [pl.BlockSpec((rows, HW), lambda g: (g, 0))]
    in_specs += [const_spec(a) for a in consts]
    out_spec = pl.BlockSpec((rows, HW), lambda g: (g, 0))

    grid = (N // nb,)
    steps = grid[0]

    # Advisory cost estimate; per review, include the constants' bytes.
    flops = steps * (2 * rows * HW * (H + W)              # pooling (NT dots)
                     + 2 * (nb * mip) * rows * (H + W)    # conv1
                     + 2 * rows * (nb * mip) * (H + W)    # conv2 + conv3
                     + 2 * rows * (H + W) * HW            # expansion dots
                     + 4 * rows * HW)                     # final products
    const_bytes = sum(int(a.size) * a.dtype.itemsize for a in consts)
    bytes_accessed = 2 * N * C * HW * 4 + steps * const_bytes
    cost = pl.CostEstimate(flops=int(flops),
                           transcendentals=int(2 * N * C * (H + W)),
                           bytes_accessed=int(bytes_accessed))

    kernel = functools.partial(_coord_att_kernel, inv_w=1.0 / W, inv_h=1.0 / H)

    out2d = pl.pallas_call(
        kernel,
        out_shape=jax.ShapeDtypeStruct((N * C, HW), jnp.float32),
        grid_spec=pltpu.PrefetchScalarGridSpec(
            num_scalar_prefetch=0,
            grid=grid,
            in_specs=in_specs,
            out_specs=out_spec,
        ),
        compiler_params=pltpu.CompilerParams(
            dimension_semantics=("parallel",),
            # Comfortable at these shapes and within v7x's 64 MiB budget;
            # raise toward 64-100 MiB on v5e/v6e for production-sized tiles.
            vmem_limit_bytes=32 * 1024 * 1024,
        ),
        cost_estimate=cost,
    )(x2d, *consts)

    return out2d.reshape(N, C, H, W)


def coord_att(x_nchw, params, *, nb=None):
    """Pallas TPU implementation of CoordAtt.forward (eval mode, BN folded)."""
    N, C, H, W = x_nchw.shape
    if nb is None:
        nb = max(1, min(N, -(-8 // C)))        # pack >= 8 sublane rows per step
        while N % nb:
            nb -= 1
    if (nb * C) % 8 != 0 and nb * C != N * C:
        nb = N                                 # full-block fallback keeps BlockSpec legal
    try:
        return _coord_att_impl(x_nchw, params, nb=nb, single_buffer_consts=True)
    except Exception:
        # pl.Buffered(1) on constant BlockSpecs not supported by this
        # jax/Mosaic version -> fall back to default double-buffering.
        return _coord_att_impl(x_nchw, params, nb=nb, single_buffer_consts=False)


def init_params(key, inp, oup, groups=32, eps=1e-5):
    """Deterministic synthetic params; eval-mode BN1 (+conv1 bias) folded."""
    mip = max(8, inp // groups)
    ks = jax.random.split(key, 10)

    def rn(k, shape, scale=0.3):
        return scale * jax.random.normal(k, shape, dtype=jnp.float32)

    w1 = rn(ks[0], (mip, inp))                   # conv1 weight (1x1)
    b1 = rn(ks[1], (mip,), 0.1)                  # conv1 bias
    g1 = 1.0 + rn(ks[2], (mip,), 0.1)            # bn1 gamma
    be1 = rn(ks[3], (mip,), 0.1)                 # bn1 beta
    rm1 = rn(ks[4], (mip,), 0.1)                 # bn1 running mean
    rv1 = 1.0 + 0.1 * jax.random.uniform(ks[5], (mip,), dtype=jnp.float32)
    s1 = g1 / jnp.sqrt(rv1 + eps)
    sh1 = (b1 - rm1) * s1 + be1                  # conv1 bias folded into BN shift

    w2 = rn(ks[6], (oup, mip))                   # conv2 weight (1x1)
    b2 = rn(ks[7], (oup,), 0.1)
    w3 = rn(ks[8], (oup, mip))                   # conv3 weight (1x1)
    b3 = rn(ks[9], (oup,), 0.1)

    col = lambda v: v.reshape(-1, 1)
    return dict(w1=w1, s1=col(s1), sh1=col(sh1),
                w2=w2, b2=col(b2), w3=w3, b3=col(b3))


def reference(x, params):
    """Pure-JAX reference mirroring the PyTorch forward (eval-mode BN folded)."""
    N, C, H, W = x.shape
    x_h = jnp.mean(x, axis=3)                                # (N, C, H)
    x_w = jnp.mean(x, axis=2)                                # (N, C, W)
    y = jnp.concatenate([x_h, x_w], axis=2)                  # (N, C, H+W)
    t = jnp.einsum("mc,ncl->nml", params["w1"], y)
    t = t * params["s1"][:, 0][None, :, None] + params["sh1"][:, 0][None, :, None]
    t = t * jnp.clip(t + 3.0, 0.0, 6.0) / 6.0                # h_swish
    t_h, t_w = t[:, :, :H], t[:, :, H:]
    a_h = jax.nn.sigmoid(jnp.einsum("om,nmh->noh", params["w2"], t_h)
                         + params["b2"][:, 0][None, :, None])
    a_w = jax.nn.sigmoid(jnp.einsum("om,nmw->now", params["w3"], t_w)
                         + params["b3"][:, 0][None, :, None])
    return x * a_h[:, :, :, None] * a_w[:, :, None, :]


if __name__ == "__main__":
    key = jax.random.PRNGKey(0)
    kx, kp = jax.random.split(key)

    N, C, H, W = 2, 4, 16, 16            # inp == oup (required by the residual product)
    x = jax.random.normal(kx, (N, C, H, W), dtype=jnp.float32)
    params = init_params(kp, C, C, groups=32)

    y = coord_att(x, params)
    y = jax.block_until_ready(y)
    assert y.shape == (N, C, H, W), y.shape

    y_ref = reference(x, params)
    err = float(jnp.max(jnp.abs(y - y_ref)))
    # bf16 MXU matmul precision (same as default precision for f32 inputs)
    # leaves a small numerical gap vs the f32 reference; a structural bug
    # would be O(0.1+).
    assert err < 3e-2, f"max abs err vs reference: {err}"
    print("KERNEL_OK")
</pallas_src>

<mosaic_0001>
module attributes {stable_mosaic.version = 11 : i64} {
  func.func @_coord_att_kernel(%arg0: i32, %arg1: memref<8x256xf32, #tpu.memory_space<vmem>>, %arg2: memref<16x256xbf16, #tpu.memory_space<vmem>>, %arg3: memref<16x256xbf16, #tpu.memory_space<vmem>>, %arg4: memref<16x8xf32, #tpu.memory_space<vmem>>, %arg5: memref<16x1xf32, #tpu.memory_space<vmem>>, %arg6: memref<8x16xf32, #tpu.memory_space<vmem>>, %arg7: memref<8x1xf32, #tpu.memory_space<vmem>>, %arg8: memref<8x16xf32, #tpu.memory_space<vmem>>, %arg9: memref<8x1xf32, #tpu.memory_space<vmem>>, %arg10: memref<8x256xf32, #tpu.memory_space<vmem>>) attributes {dimension_semantics = [#tpu.dimension_semantics<parallel>], iteration_bounds = array<i64: 1>, scalar_prefetch = 0 : i64, scratch_operands = 0 : i64, tpu.core_type = #tpu.core_type<tc>, window_params = [{transform_indices = @transform_0, window_bounds = array<i64: 8, 256>}, {pipeline_mode = #tpu.pipeline_mode<synchronous>, transform_indices = @transform_1, window_bounds = array<i64: 16, 256>}, {pipeline_mode = #tpu.pipeline_mode<synchronous>, transform_indices = @transform_2, window_bounds = array<i64: 16, 256>}, {pipeline_mode = #tpu.pipeline_mode<synchronous>, transform_indices = @transform_3, window_bounds = array<i64: 16, 8>}, {pipeline_mode = #tpu.pipeline_mode<synchronous>, transform_indices = @transform_4, window_bounds = array<i64: 16, 1>}, {pipeline_mode = #tpu.pipeline_mode<synchronous>, transform_indices = @transform_5, window_bounds = array<i64: 8, 16>}, {pipeline_mode = #tpu.pipeline_mode<synchronous>, transform_indices = @transform_6, window_bounds = array<i64: 8, 1>}, {pipeline_mode = #tpu.pipeline_mode<synchronous>, transform_indices = @transform_7, window_bounds = array<i64: 8, 16>}, {pipeline_mode = #tpu.pipeline_mode<synchronous>, transform_indices = @transform_8, window_bounds = array<i64: 8, 1>}, {transform_indices = @transform_9, window_bounds = array<i64: 8, 256>}]} {
    %c0 = arith.constant 0 : index
    %c0_0 = arith.constant 0 : index
    %0 = vector.load %arg1[%c0, %c0_0] : memref<8x256xf32, #tpu.memory_space<vmem>>, vector<8x256xf32>
    %1 = arith.truncf %0 : vector<8x256xf32> to vector<8x256xbf16>
    %c0_1 = arith.constant 0 : index
    %c0_2 = arith.constant 0 : index
    %2 = vector.load %arg2[%c0_1, %c0_2] : memref<16x256xbf16, #tpu.memory_space<vmem>>, vector<16x256xbf16>
    %cst = arith.constant dense<0.000000e+00> : vector<8x16xf32>
    %3 = tpu.matmul %1, %2, %cst {dimension_numbers = #tpu.dot_dimension_numbers<[1], [1], [0], [0], [0, 0, 1, 0], [], []>} : vector<8x256xbf16>, vector<16x256xbf16>, vector<8x16xf32> -> vector<8x16xf32>
    %cst_3 = arith.constant 6.250000e-02 : f32
    %4 = vector.broadcast %cst_3 : f32 to vector<8x16xf32>
    %5 = arith.mulf %3, %4 : vector<8x16xf32>
    %c0_4 = arith.constant 0 : index
    %c0_5 = arith.constant 0 : index
    %6 = vector.load %arg3[%c0_4, %c0_5] : memref<16x256xbf16, #tpu.memory_space<vmem>>, vector<16x256xbf16>
    %cst_6 = arith.constant dense<0.000000e+00> : vector<8x16xf32>
    %7 = tpu.matmul %1, %6, %cst_6 {dimension_numbers = #tpu.dot_dimension_numbers<[1], [1], [0], [0], [0, 0, 1, 0], [], []>} : vector<8x256xbf16>, vector<16x256xbf16>, vector<8x16xf32> -> vector<8x16xf32>
    %cst_7 = arith.constant 6.250000e-02 : f32
    %8 = vector.broadcast %cst_7 : f32 to vector<8x16xf32>
    %9 = arith.mulf %7, %8 : vector<8x16xf32>
    %c0_8 = arith.constant 0 : index
    %c0_9 = arith.constant 0 : index
    %10 = vector.load %arg4[%c0_8, %c0_9] : memref<16x8xf32, #tpu.memory_space<vmem>>, vector<16x8xf32>
    %cst_10 = arith.constant dense<0.000000e+00> : vector<16x16xf32>
    %11 = tpu.matmul %10, %5, %cst_10 {dimension_numbers = #tpu.dot_dimension_numbers<[1], [0], [0], [1], [0, 0, 1, 1], [], []>} : vector<16x8xf32>, vector<8x16xf32>, vector<16x16xf32> -> vector<16x16xf32>
    %c0_11 = arith.constant 0 : index
    %c0_12 = arith.constant 0 : index
    %12 = vector.load %arg5[%c0_11, %c0_12] : memref<16x1xf32, #tpu.memory_space<vmem>>, vector<16x1xf32>
    %13 = vector.broadcast %12 : vector<16x1xf32> to vector<16x16xf32>
    %14 = arith.addf %11, %13 : vector<16x16xf32>
    %c0_13 = arith.constant 0 : index
    %c0_14 = arith.constant 0 : index
    %15 = vector.load %arg4[%c0_13, %c0_14] : memref<16x8xf32, #tpu.memory_space<vmem>>, vector<16x8xf32>
    %cst_15 = arith.constant dense<0.000000e+00> : vector<16x16xf32>
    %16 = tpu.matmul %15, %9, %cst_15 {dimension_numbers = #tpu.dot_dimension_numbers<[1], [0], [0], [1], [0, 0, 1, 1], [], []>} : vector<16x8xf32>, vector<8x16xf32>, vector<16x16xf32> -> vector<16x16xf32>
    %c0_16 = arith.constant 0 : index
    %c0_17 = arith.constant 0 : index
    %17 = vector.load %arg5[%c0_16, %c0_17] : memref<16x1xf32, #tpu.memory_space<vmem>>, vector<16x1xf32>
    %18 = vector.broadcast %17 : vector<16x1xf32> to vector<16x16xf32>
    %19 = arith.addf %16, %18 : vector<16x16xf32>
    %cst_18 = arith.constant 3.000000e+00 : f32
    %20 = vector.broadcast %cst_18 : f32 to vector<16x16xf32>
    %21 = arith.addf %14, %20 : vector<16x16xf32>
    %cst_19 = arith.constant 0.000000e+00 : f32
    %cst_20 = arith.constant 6.000000e+00 : f32
    %22 = vector.broadcast %cst_19 : f32 to vector<16x16xf32>
    %23 = arith.maximumf %22, %21 : vector<16x16xf32>
    %24 = vector.broadcast %cst_20 : f32 to vector<16x16xf32>
    %25 = arith.minimumf %24, %23 : vector<16x16xf32>
    %cst_21 = arith.constant 0.166666672 : f32
    %26 = vector.broadcast %cst_21 : f32 to vector<16x16xf32>
    %27 = arith.mulf %25, %26 : vector<16x16xf32>
    %28 = arith.mulf %14, %27 : vector<16x16xf32>
    %cst_22 = arith.constant 3.000000e+00 : f32
    %29 = vector.broadcast %cst_22 : f32 to vector<16x16xf32>
    %30 = arith.addf %19, %29 : vector<16x16xf32>
    %cst_23 = arith.constant 0.000000e+00 : f32
    %cst_24 = arith.constant 6.000000e+00 : f32
    %31 = vector.broadcast %cst_23 : f32 to vector<16x16xf32>
    %32 = arith.maximumf %31, %30 : vector<16x16xf32>
    %33 = vector.broadcast %cst_24 : f32 to vector<16x16xf32>
    %34 = arith.minimumf %33, %32 : vector<16x16xf32>
    %cst_25 = arith.constant 0.166666672 : f32
    %35 = vector.broadcast %cst_25 : f32 to vector<16x16xf32>
    %36 = arith.mulf %34, %35 : vector<16x16xf32>
    %37 = arith.mulf %19, %36 : vector<16x16xf32>
    %c0_26 = arith.constant 0 : index
    %c0_27 = arith.constant 0 : index
    %38 = vector.load %arg6[%c0_26, %c0_27] : memref<8x16xf32, #tpu.memory_space<vmem>>, vector<8x16xf32>
    %cst_28 = arith.constant dense<0.000000e+00> : vector<8x16xf32>
    %39 = tpu.matmul %38, %28, %cst_28 {dimension_numbers = #tpu.dot_dimension_numbers<[1], [0], [0], [1], [0, 0, 1, 1], [], []>} : vector<8x16xf32>, vector<16x16xf32>, vector<8x16xf32> -> vector<8x16xf32>
    %c0_29 = arith.constant 0 : index
    %c0_30 = arith.constant 0 : index
    %40 = vector.load %arg7[%c0_29, %c0_30] : memref<8x1xf32, #tpu.memory_space<vmem>>, vector<8x1xf32>
    %41 = vector.broadcast %40 : vector<8x1xf32> to vector<8x16xf32>
    %42 = arith.addf %39, %41 : vector<8x16xf32>
    %c0_31 = arith.constant 0 : index
    %c0_32 = arith.constant 0 : index
    %43 = vector.load %arg8[%c0_31, %c0_32] : memref<8x16xf32, #tpu.memory_space<vmem>>, vector<8x16xf32>
    %cst_33 = arith.constant dense<0.000000e+00> : vector<8x16xf32>
    %44 = tpu.matmul %43, %37, %cst_33 {dimension_numbers = #tpu.dot_dimension_numbers<[1], [0], [0], [1], [0, 0, 1, 1], [], []>} : vector<8x16xf32>, vector<16x16xf32>, vector<8x16xf32> -> vector<8x16xf32>
    %c0_34 = arith.constant 0 : index
    %c0_35 = arith.constant 0 : index
    %45 = vector.load %arg9[%c0_34, %c0_35] : memref<8x1xf32, #tpu.memory_space<vmem>>, vector<8x1xf32>
    %46 = vector.broadcast %45 : vector<8x1xf32> to vector<8x16xf32>
    %47 = arith.addf %44, %46 : vector<8x16xf32>
    %cst_36 = arith.constant 0.000000e+00 : f32
    %48 = vector.broadcast %cst_36 : f32 to vector<8x16xf32>
    %49 = arith.subf %48, %42 : vector<8x16xf32>
    %50 = math.exp %49 : vector<8x16xf32>
    %cst_37 = arith.constant 1.000000e+00 : f32
    %51 = vector.broadcast %cst_37 : f32 to vector<8x16xf32>
    %52 = arith.addf %51, %50 : vector<8x16xf32>
    %53 = tpu.reciprocal %52 {approx = true} : vector<8x16xf32> -> vector<8x16xf32>
    %cst_38 = arith.constant 0.000000e+00 : f32
    %54 = vector.broadcast %cst_38 : f32 to vector<8x16xf32>
    %55 = arith.subf %54, %47 : vector<8x16xf32>
    %56 = math.exp %55 : vector<8x16xf32>
    %cst_39 = arith.constant 1.000000e+00 : f32
    %57 = vector.broadcast %cst_39 : f32 to vector<8x16xf32>
    %58 = arith.addf %57, %56 : vector<8x16xf32>
    %59 = tpu.reciprocal %58 {approx = true} : vector<8x16xf32> -> vector<8x16xf32>
    %60 = arith.truncf %53 : vector<8x16xf32> to vector<8x16xbf16>
    %c0_40 = arith.constant 0 : index
    %c0_41 = arith.constant 0 : index
    %61 = vector.load %arg2[%c0_40, %c0_41] : memref<16x256xbf16, #tpu.memory_space<vmem>>, vector<16x256xbf16>
    %cst_42 = arith.constant dense<0.000000e+00> : vector<8x256xf32>
    %62 = tpu.matmul %60, %61, %cst_42 {dimension_numbers = #tpu.dot_dimension_numbers<[1], [0], [0], [1], [0, 0, 1, 1], [], []>} : vector<8x16xbf16>, vector<16x256xbf16>, vector<8x256xf32> -> vector<8x256xf32>
    %63 = arith.truncf %59 : vector<8x16xf32> to vector<8x16xbf16>
    %c0_43 = arith.constant 0 : index
    %c0_44 = arith.constant 0 : index
    %64 = vector.load %arg3[%c0_43, %c0_44] : memref<16x256xbf16, #tpu.memory_space<vmem>>, vector<16x256xbf16>
    %cst_45 = arith.constant dense<0.000000e+00> : vector<8x256xf32>
    %65 = tpu.matmul %63, %64, %cst_45 {dimension_numbers = #tpu.dot_dimension_numbers<[1], [0], [0], [1], [0, 0, 1, 1], [], []>} : vector<8x16xbf16>, vector<16x256xbf16>, vector<8x256xf32> -> vector<8x256xf32>
    %66 = arith.mulf %0, %62 : vector<8x256xf32>
    %67 = arith.mulf %66, %65 : vector<8x256xf32>
    %c0_46 = arith.constant 0 : index
    %c0_47 = arith.constant 0 : index
    %68 = vector.load %arg10[%c0_46, %c0_47] : memref<8x256xf32, #tpu.memory_space<vmem>>, vector<8x256xf32>
    tpu.vector_store %arg10[%c0_46, %c0_47], %67 {strides = array<i32>} : memref<8x256xf32, #tpu.memory_space<vmem>>, vector<8x256xf32>,
    return
  }
  func.func @transform_0(%arg0: i32) -> (i32, i32) {
    %c0_i32 = arith.constant 0 : i32
    %c0_i32_0 = arith.constant 0 : i32
    return %arg0, %c0_i32 : i32, i32
  }
  func.func @transform_1(%arg0: i32) -> (i32, i32) {
    %c0_i32 = arith.constant 0 : i32
    %c0_i32_0 = arith.constant 0 : i32
    %c0_i32_1 = arith.constant 0 : i32
    return %c0_i32, %c0_i32_0 : i32, i32
  }
  func.func @transform_2(%arg0: i32) -> (i32, i32) {
    %c0_i32 = arith.constant 0 : i32
    %c0_i32_0 = arith.constant 0 : i32
    %c0_i32_1 = arith.constant 0 : i32
    return %c0_i32, %c0_i32_0 : i32, i32
  }
  func.func @transform_3(%arg0: i32) -> (i32, i32) {
    %c0_i32 = arith.constant 0 : i32
    %c0_i32_0 = arith.constant 0 : i32
    %c0_i32_1 = arith.constant 0 : i32
    return %c0_i32, %c0_i32_0 : i32, i32
  }
  func.func @transform_4(%arg0: i32) -> (i32, i32) {
    %c0_i32 = arith.constant 0 : i32
    %c0_i32_0 = arith.constant 0 : i32
    %c0_i32_1 = arith.constant 0 : i32
    return %c0_i32, %c0_i32_0 : i32, i32
  }
  func.func @transform_5(%arg0: i32) -> (i32, i32) {
    %c0_i32 = arith.constant 0 : i32
    %c0_i32_0 = arith.constant 0 : i32
    %c0_i32_1 = arith.constant 0 : i32
    return %c0_i32, %c0_i32_0 : i32, i32
  }
  func.func @transform_6(%arg0: i32) -> (i32, i32) {
    %c0_i32 = arith.constant 0 : i32
    %c0_i32_0 = arith.constant 0 : i32
    %c0_i32_1 = arith.constant 0 : i32
    return %c0_i32, %c0_i32_0 : i32, i32
  }
  func.func @transform_7(%arg0: i32) -> (i32, i32) {
    %c0_i32 = arith.constant 0 : i32
    %c0_i32_0 = arith.constant 0 : i32
    %c0_i32_1 = arith.constant 0 : i32
    return %c0_i32, %c0_i32_0 : i32, i32
  }
  func.func @transform_8(%arg0: i32) -> (i32, i32) {
    %c0_i32 = arith.constant 0 : i32
    %c0_i32_0 = arith.constant 0 : i32
    %c0_i32_1 = arith.constant 0 : i32
    return %c0_i32, %c0_i32_0 : i32, i32
  }
  func.func @transform_9(%arg0: i32) -> (i32, i32) {
    %c0_i32 = arith.constant 0 : i32
    %c0_i32_0 = arith.constant 0 : i32
    return %arg0, %c0_i32 : i32, i32
  }
}

module attributes {stable_mosaic.version = 11 : i64} {
  func.func @_coord_att_kernel(%arg0: i32, %arg1: memref<8x256xf32, #tpu.memory_space<vmem>>, %arg2: memref<16x256xbf16, #tpu.memory_space<vmem>>, %arg3: memref<16x256xbf16, #tpu.memory_space<vmem>>, %arg4: memref<16x8xf32, #tpu.memory_space<vmem>>, %arg5: memref<16x1xf32, #tpu.memory_space<vmem>>, %arg6: memref<8x16xf32, #tpu.memory_space<vmem>>, %arg7: memref<8x1xf32, #tpu.memory_space<vmem>>, %arg8: memref<8x16xf32, #tpu.memory_space<vmem>>, %arg9: memref<8x1xf32, #tpu.memory_space<vmem>>, %arg10: memref<8x256xf32, #tpu.memory_space<vmem>>) attributes {dimension_semantics = [#tpu.dimension_semantics<parallel>], iteration_bounds = array<i64: 1>, scalar_prefetch = 0 : i64, scratch_operands = 0 : i64, tpu.core_type = #tpu.core_type<tc>, window_params = [{transform_indices = @transform_0, window_bounds = array<i64: 8, 256>}, {pipeline_mode = #tpu.pipeline_mode<synchronous>, transform_indices = @transform_1, window_bounds = array<i64: 16, 256>}, {pipeline_mode = #tpu.pipeline_mode<synchronous>, transform_indices = @transform_2, window_bounds = array<i64: 16, 256>}, {pipeline_mode = #tpu.pipeline_mode<synchronous>, transform_indices = @transform_3, window_bounds = array<i64: 16, 8>}, {pipeline_mode = #tpu.pipeline_mode<synchronous>, transform_indices = @transform_4, window_bounds = array<i64: 16, 1>}, {pipeline_mode = #tpu.pipeline_mode<synchronous>, transform_indices = @transform_5, window_bounds = array<i64: 8, 16>}, {pipeline_mode = #tpu.pipeline_mode<synchronous>, transform_indices = @transform_6, window_bounds = array<i64: 8, 1>}, {pipeline_mode = #tpu.pipeline_mode<synchronous>, transform_indices = @transform_7, window_bounds = array<i64: 8, 16>}, {pipeline_mode = #tpu.pipeline_mode<synchronous>, transform_indices = @transform_8, window_bounds = array<i64: 8, 1>}, {transform_indices = @transform_9, window_bounds = array<i64: 8, 256>}]} {
    %c0 = arith.constant 0 : index
    %c0_0 = arith.constant 0 : index
    %0 = vector.load %arg1[%c0, %c0_0] : memref<8x256xf32, #tpu.memory_space<vmem>>, vector<8x256xf32>
    %1 = arith.truncf %0 : vector<8x256xf32> to vector<8x256xbf16>
    %c0_1 = arith.constant 0 : index
    %c0_2 = arith.constant 0 : index
    %2 = vector.load %arg2[%c0_1, %c0_2] : memref<16x256xbf16, #tpu.memory_space<vmem>>, vector<16x256xbf16>
    %cst = arith.constant dense<0.000000e+00> : vector<8x16xf32>
    %3 = tpu.matmul %1, %2, %cst {dimension_numbers = #tpu.dot_dimension_numbers<[1], [1], [0], [0], [0, 0, 1, 0], [], []>} : vector<8x256xbf16>, vector<16x256xbf16>, vector<8x16xf32> -> vector<8x16xf32>
    %cst_3 = arith.constant 6.250000e-02 : f32
    %4 = vector.broadcast %cst_3 : f32 to vector<8x16xf32>
    %5 = arith.mulf %3, %4 : vector<8x16xf32>
    %c0_4 = arith.constant 0 : index
    %c0_5 = arith.constant 0 : index
    %6 = vector.load %arg3[%c0_4, %c0_5] : memref<16x256xbf16, #tpu.memory_space<vmem>>, vector<16x256xbf16>
    %cst_6 = arith.constant dense<0.000000e+00> : vector<8x16xf32>
    %7 = tpu.matmul %1, %6, %cst_6 {dimension_numbers = #tpu.dot_dimension_numbers<[1], [1], [0], [0], [0, 0, 1, 0], [], []>} : vector<8x256xbf16>, vector<16x256xbf16>, vector<8x16xf32> -> vector<8x16xf32>
    %cst_7 = arith.constant 6.250000e-02 : f32
    %8 = vector.broadcast %cst_7 : f32 to vector<8x16xf32>
    %9 = arith.mulf %7, %8 : vector<8x16xf32>
    %c0_8 = arith.constant 0 : index
    %c0_9 = arith.constant 0 : index
    %10 = vector.load %arg4[%c0_8, %c0_9] : memref<16x8xf32, #tpu.memory_space<vmem>>, vector<16x8xf32>
    %cst_10 = arith.constant dense<0.000000e+00> : vector<16x16xf32>
    %11 = tpu.matmul %10, %5, %cst_10 {dimension_numbers = #tpu.dot_dimension_numbers<[1], [0], [0], [1], [0, 0, 1, 1], [], []>} : vector<16x8xf32>, vector<8x16xf32>, vector<16x16xf32> -> vector<16x16xf32>
    %c0_11 = arith.constant 0 : index
    %c0_12 = arith.constant 0 : index
    %12 = vector.load %arg5[%c0_11, %c0_12] : memref<16x1xf32, #tpu.memory_space<vmem>>, vector<16x1xf32>
    %13 = vector.broadcast %12 : vector<16x1xf32> to vector<16x16xf32>
    %14 = arith.addf %11, %13 : vector<16x16xf32>
    %c0_13 = arith.constant 0 : index
    %c0_14 = arith.constant 0 : index
    %15 = vector.load %arg4[%c0_13, %c0_14] : memref<16x8xf32, #tpu.memory_space<vmem>>, vector<16x8xf32>
    %cst_15 = arith.constant dense<0.000000e+00> : vector<16x16xf32>
    %16 = tpu.matmul %15, %9, %cst_15 {dimension_numbers = #tpu.dot_dimension_numbers<[1], [0], [0], [1], [0, 0, 1, 1], [], []>} : vector<16x8xf32>, vector<8x16xf32>, vector<16x16xf32> -> vector<16x16xf32>
    %c0_16 = arith.constant 0 : index
    %c0_17 = arith.constant 0 : index
    %17 = vector.load %arg5[%c0_16, %c0_17] : memref<16x1xf32, #tpu.memory_space<vmem>>, vector<16x1xf32>
    %18 = vector.broadcast %17 : vector<16x1xf32> to vector<16x16xf32>
    %19 = arith.addf %16, %18 : vector<16x16xf32>
    %cst_18 = arith.constant 3.000000e+00 : f32
    %20 = vector.broadcast %cst_18 : f32 to vector<16x16xf32>
    %21 = arith.addf %14, %20 : vector<16x16xf32>
    %cst_19 = arith.constant 0.000000e+00 : f32
    %cst_20 = arith.constant 6.000000e+00 : f32
    %22 = vector.broadcast %cst_19 : f32 to vector<16x16xf32>
    %23 = arith.maximumf %22, %21 : vector<16x16xf32>
    %24 = vector.broadcast %cst_20 : f32 to vector<16x16xf32>
    %25 = arith.minimumf %24, %23 : vector<16x16xf32>
    %cst_21 = arith.constant 0.166666672 : f32
    %26 = vector.broadcast %cst_21 : f32 to vector<16x16xf32>
    %27 = arith.mulf %25, %26 : vector<16x16xf32>
    %28 = arith.mulf %14, %27 : vector<16x16xf32>
    %cst_22 = arith.constant 3.000000e+00 : f32
    %29 = vector.broadcast %cst_22 : f32 to vector<16x16xf32>
    %30 = arith.addf %19, %29 : vector<16x16xf32>
    %cst_23 = arith.constant 0.000000e+00 : f32
    %cst_24 = arith.constant 6.000000e+00 : f32
    %31 = vector.broadcast %cst_23 : f32 to vector<16x16xf32>
    %32 = arith.maximumf %31, %30 : vector<16x16xf32>
    %33 = vector.broadcast %cst_24 : f32 to vector<16x16xf32>
    %34 = arith.minimumf %33, %32 : vector<16x16xf32>
    %cst_25 = arith.constant 0.166666672 : f32
    %35 = vector.broadcast %cst_25 : f32 to vector<16x16xf32>
    %36 = arith.mulf %34, %35 : vector<16x16xf32>
    %37 = arith.mulf %19, %36 : vector<16x16xf32>
    %c0_26 = arith.constant 0 : index
    %c0_27 = arith.constant 0 : index
    %38 = vector.load %arg6[%c0_26, %c0_27] : memref<8x16xf32, #tpu.memory_space<vmem>>, vector<8x16xf32>
    %cst_28 = arith.constant dense<0.000000e+00> : vector<8x16xf32>
    %39 = tpu.matmul %38, %28, %cst_28 {dimension_numbers = #tpu.dot_dimension_numbers<[1], [0], [0], [1], [0, 0, 1, 1], [], []>} : vector<8x16xf32>, vector<16x16xf32>, vector<8x16xf32> -> vector<8x16xf32>
    %c0_29 = arith.constant 0 : index
    %c0_30 = arith.constant 0 : index
    %40 = vector.load %arg7[%c0_29, %c0_30] : memref<8x1xf32, #tpu.memory_space<vmem>>, vector<8x1xf32>
    %41 = vector.broadcast %40 : vector<8x1xf32> to vector<8x16xf32>
    %42 = arith.addf %39, %41 : vector<8x16xf32>
    %c0_31 = arith.constant 0 : index
    %c0_32 = arith.constant 0 : index
    %43 = vector.load %arg8[%c0_31, %c0_32] : memref<8x16xf32, #tpu.memory_space<vmem>>, vector<8x16xf32>
    %cst_33 = arith.constant dense<0.000000e+00> : vector<8x16xf32>
    %44 = tpu.matmul %43, %37, %cst_33 {dimension_numbers = #tpu.dot_dimension_numbers<[1], [0], [0], [1], [0, 0, 1, 1], [], []>} : vector<8x16xf32>, vector<16x16xf32>, vector<8x16xf32> -> vector<8x16xf32>
    %c0_34 = arith.constant 0 : index
    %c0_35 = arith.constant 0 : index
    %45 = vector.load %arg9[%c0_34, %c0_35] : memref<8x1xf32, #tpu.memory_space<vmem>>, vector<8x1xf32>
    %46 = vector.broadcast %45 : vector<8x1xf32> to vector<8x16xf32>
    %47 = arith.addf %44, %46 : vector<8x16xf32>
    %cst_36 = arith.constant 0.000000e+00 : f32
    %48 = vector.broadcast %cst_36 : f32 to vector<8x16xf32>
    %49 = arith.subf %48, %42 : vector<8x16xf32>
    %50 = math.exp %49 : vector<8x16xf32>
    %cst_37 = arith.constant 1.000000e+00 : f32
    %51 = vector.broadcast %cst_37 : f32 to vector<8x16xf32>
    %52 = arith.addf %51, %50 : vector<8x16xf32>
    %53 = tpu.reciprocal %52 {approx = true} : vector<8x16xf32> -> vector<8x16xf32>
    %cst_38 = arith.constant 0.000000e+00 : f32
    %54 = vector.broadcast %cst_38 : f32 to vector<8x16xf32>
    %55 = arith.subf %54, %47 : vector<8x16xf32>
    %56 = math.exp %55 : vector<8x16xf32>
    %cst_39 = arith.constant 1.000000e+00 : f32
    %57 = vector.broadcast %cst_39 : f32 to vector<8x16xf32>
    %58 = arith.addf %57, %56 : vector<8x16xf32>
    %59 = tpu.reciprocal %58 {approx = true} : vector<8x16xf32> -> vector<8x16xf32>
    %60 = arith.truncf %53 : vector<8x16xf32> to vector<8x16xbf16>
    %c0_40 = arith.constant 0 : index
    %c0_41 = arith.constant 0 : index
    %61 = vector.load %arg2[%c0_40, %c0_41] : memref<16x256xbf16, #tpu.memory_space<vmem>>, vector<16x256xbf16>
    %cst_42 = arith.constant dense<0.000000e+00> : vector<8x256xf32>
    %62 = tpu.matmul %60, %61, %cst_42 {dimension_numbers = #tpu.dot_dimension_numbers<[1], [0], [0], [1], [0, 0, 1, 1], [], []>} : vector<8x16xbf16>, vector<16x256xbf16>, vector<8x256xf32> -> vector<8x256xf32>
    %63 = arith.truncf %59 : vector<8x16xf32> to vector<8x16xbf16>
    %c0_43 = arith.constant 0 : index
    %c0_44 = arith.constant 0 : index
    %64 = vector.load %arg3[%c0_43, %c0_44] : memref<16x256xbf16, #tpu.memory_space<vmem>>, vector<16x256xbf16>
    %cst_45 = arith.constant dense<0.000000e+00> : vector<8x256xf32>
    %65 = tpu.matmul %63, %64, %cst_45 {dimension_numbers = #tpu.dot_dimension_numbers<[1], [0], [0], [1], [0, 0, 1, 1], [], []>} : vector<8x16xbf16>, vector<16x256xbf16>, vector<8x256xf32> -> vector<8x256xf32>
    %66 = arith.mulf %0, %62 : vector<8x256xf32>
    %67 = arith.mulf %66, %65 : vector<8x256xf32>
    %c0_46 = arith.constant 0 : index
    %c0_47 = arith.constant 0 : index
    %68 = vector.load %arg10[%c0_46, %c0_47] : memref<8x256xf32, #tpu.memory_space<vmem>>, vector<8x256xf32>
    tpu.vector_store %arg10[%c0_46, %c0_47], %67 {strides = array<i32>} : memref<8x256xf32, #tpu.memory_space<vmem>>, vector<8x256xf32>,
    return
  }
  func.func @transform_0(%arg0: i32) -> (i32, i32) {
    %c0_i32 = arith.constant 0 : i32
    %c0_i32_0 = arith.constant 0 : i32
    return %arg0, %c0_i32 : i32, i32
  }
  func.func @transform_1(%arg0: i32) -> (i32, i32) {
    %c0_i32 = arith.constant 0 : i32
    %c0_i32_0 = arith.constant 0 : i32
    %c0_i32_1 = arith.constant 0 : i32
    return %c0_i32, %c0_i32_0 : i32, i32
  }
  func.func @transform_2(%arg0: i32) -> (i32, i32) {
    %c0_i32 = arith.constant 0 : i32
    %c0_i32_0 = arith.constant 0 : i32
    %c0_i32_1 = arith.constant 0 : i32
    return %c0_i32, %c0_i32_0 : i32, i32
  }
  func.func @transform_3(%arg0: i32) -> (i32, i32) {
    %c0_i32 = arith.constant 0 : i32
    %c0_i32_0 = arith.constant 0 : i32
    %c0_i32_1 = arith.constant 0 : i32
    return %c0_i32, %c0_i32_0 : i32, i32
  }
  func.func @transform_4(%arg0: i32) -> (i32, i32) {
    %c0_i32 = arith.constant 0 : i32
    %c0_i32_0 = arith.constant 0 : i32
    %c0_i32_1 = arith.constant 0 : i32
    return %c0_i32, %c0_i32_0 : i32, i32
  }
  func.func @transform_5(%arg0: i32) -> (i32, i32) {
    %c0_i32 = arith.constant 0 : i32
    %c0_i32_0 = arith.constant 0 : i32
    %c0_i32_1 = arith.constant 0 : i32
    return %c0_i32, %c0_i32_0 : i32, i32
  }
  func.func @transform_6(%arg0: i32) -> (i32, i32) {
    %c0_i32 = arith.constant 0 : i32
    %c0_i32_0 = arith.constant 0 : i32
    %c0_i32_1 = arith.constant 0 : i32
    return %c0_i32, %c0_i32_0 : i32, i32
  }
  func.func @transform_7(%arg0: i32) -> (i32, i32) {
    %c0_i32 = arith.constant 0 : i32
    %c0_i32_0 = arith.constant 0 : i32
    %c0_i32_1 = arith.constant 0 : i32
    return %c0_i32, %c0_i32_0 : i32, i32
  }
  func.func @transform_8(%arg0: i32) -> (i32, i32) {
    %c0_i32 = arith.constant 0 : i32
    %c0_i32_0 = arith.constant 0 : i32
    %c0_i32_1 = arith.constant 0 : i32
    return %c0_i32, %c0_i32_0 : i32, i32
  }
  func.func @transform_9(%arg0: i32) -> (i32, i32) {
    %c0_i32 = arith.constant 0 : i32
    %c0_i32_0 = arith.constant 0 : i32
    return %arg0, %c0_i32 : i32, i32
  }
}

</mosaic_0001>

<bundles_post_ra>
// kernel: tpu_custom_call.1
= control target key start
LH: loop header
LB: loop body
LE: loop exit
PB: predicated region body
PF: predicated region fallthrough
CT: control target
= control target key end

     0   :  { %s862_s0 = inlined_call_operand.vmem [shape: f32[8,256], index: 0, kind: input, shape index: {}]   ;;  %s863_s1 = inlined_call_operand.vmem [shape: bf16[16,256], index: 1, kind: input, shape index: {}]   ;;  %s864_s2 = inlined_call_operand.vmem [shape: bf16[16,256], index: 2, kind: input, shape index: {}]   ;;  %s865_s3 = inlined_call_operand.vmem [shape: f32[16,8], index: 3, kind: input, shape index: {}]   ;;  %s866_s4 = inlined_call_operand.vmem [shape: f32[16,1], index: 4, kind: input, shape index: {}]   ;;  %s867_s5 = inlined_call_operand.vmem [shape: f32[8,16], index: 5, kind: input, shape index: {}]   ;;  %s868_s6 = inlined_call_operand.vmem [shape: f32[8,1], index: 6, kind: input, shape index: {}]   ;;  %s869_s7 = inlined_call_operand.vmem [shape: f32[8,16], index: 7, kind: input, shape index: {}]   ;;  %s870_s8 = inlined_call_operand.vmem [shape: f32[8,1], index: 8, kind: input, shape index: {}]   ;;  %s871_s9 = inlined_call_operand.hbm [shape: f32[8,256], index: 9, kind: output, shape index: {}]  }
   0x1   :  { %v773_v0 = vld [vmem:[%s863_s1 + $0x4] ss:$8 sps:$4 sm:$0xff]   ;;  %v784_v2 = vld [vmem:[%s863_s1] ss:$8 sps:$4 sm:$0xff]  }
   0x2   :  { %v778_v1 = vld [vmem:[%s864_s2 + $0x4] ss:$8 sps:$4 sm:$0xff]   ;;  %50 = vmatprep.subr.bf16.mxu0 %v773_v0  ;;  %v789_v3 = vld [vmem:[%s864_s2] ss:$8 sps:$4 sm:$0xff]  }
   0x3   :  { %v794_v4 = vld [vmem:[%s862_s0 + $0x8] sm:$0xff]  ;;  %103 = vmatprep.subr.bf16.mxu1 %v778_v1 }
   0x4   :  { %v37_v5 = vpack.c.bf16 %v794_v4, %v794_v4 }
   0x5   :  { %14 = vsyncpa [#allocation3], 0  ;;  %51 = vmatpush1.bf16.xpose.msra.mxu0 %v784_v2  ;;  %104 = vmatpush1.bf16.xpose.msra.mxu1 %v789_v3  ;;  %v804_v6 = vld [vmem:[%s862_s0] sm:$0xff]  ;;  %vm158_vm0 = vcmask 64512   ;;  %v715_v10 = vmov 0   ;;  %v147_v11 = vld [vmem:[%s866_s4 + $0x8] sm:$0xff] }
   0x6   :  { %82 = vmatprep.mubr.bf16.mxu0 %v37_v5  ;;  %135 = vmatprep.mubr.bf16.mxu1 %v37_v5  ;;  %v36_v7 = vpack.c.bf16 %v804_v6, %v804_v6  ;;  %v144_v8 = vld [vmem:[%s865_s3] sm:$0xff]  ;;  %v145_v20 = vld [vmem:[%s865_s3 + $0x8] sm:$0xff]  ;;  %v716_v23 = vmov 0.0|0.0   ;;  %vm717_vm1 = vmmov 0   ;;  %v718_v24 = vmov 0.0  }
   0x7   :  { %v146_v9 = vld [vmem:[%s866_s4] sm:$0xff]  ;;  %675 = vset.pattern.permute.xlu0 %v715_v10  ;;  %676 = vset.pattern.permute.xlu1 %v715_v10  ;;  %vm342_vm2 = vcmask 130048  }
   0x8   :  { %150 = vperm.xlu0 %675, %v146_v9   ;;  %v336_v25 = vld [vmem:[%s868_s6] sm:$0xff] }
   0x9   :  { %339 = vperm.xlu1 %676, %v336_v25   ;;  %v417_v26 = vld [vmem:[%s870_s8] sm:$0xff] }
   0xa   :  { %v335_v59 = vld [vmem:[%s867_s5] sm:$0xff]  ;;  %s719_s5 = smov [#allocation2]  }
   0xb   :  { %v416_v60 = vld [vmem:[%s869_s7] sm:$0xff]  ;;  %s608_s7 = sshll.u32 %s719_s5, 4  ;;  %s609_s7 = int_to_ptr.vmem [resolvable:$true] %s608_s7 }
   0xc   :  { %83 = vmatmul.mubr.bf16.vlgmr.msra.gmra.mrb[0].mxu0 %v36_v7  ;;  %136 = vmatmul.mubr.bf16.vlgmr.msra.gmra.mrb[0].mxu1 %v36_v7  ;;  %s691_s30 = scalar_lea.vmem %s609_s7, 256  ;;  %p696_p1 = scmp.lt.s32.totalorder %s609_s7, %s609_s7 }
   0xd   :  { %642 = vmatprep.mubr.msk.f32.mxu0 %vm158_vm0, %v144_v8  ;;  %647 = vmatprep.mubr.msk.f32.mxu1 %vm158_vm0, %v144_v8  ;;  %p692_p0 = scmp.ne.s32.totalorder %s609_s7, %s691_s30  ;;  %p697_p2 = scmp.lt.s32.totalorder %s691_s30, %s691_s30 }
   0xe   :  { %155 = vperm.xlu0 %675, %v147_v11   ;;  %420 = vperm.xlu1 %676, %v417_v26  }
   0xf   :  { %p698_p3 = por %p697_p2, %p696_p1 }
  0x11   :  { %p699_p4 = pnand %p698_p3, %p692_p0 }
  0x87   :  { %v151_v27 = vpop.permute.xlu0 %150 }
  0x88   :  { %v340_v61 = vpop.permute.xlu1 %339 }
  0x8d   :  { %v156_v28 = vpop.permute.xlu0 %155  ;;  %v421_v62 = vpop.permute.xlu1 %420 }
  0xdf   :  { %v84_v12 = vpop.f32.mrb[0].mxu0  ;;  %v137_v13 = vpop.f32.mrb[0].mxu1 }
  0xe0   :  { %v90_v14 = vmul.f32 0.0625, %v84_v12  ;;  %v143_v15 = vmul.f32 0.0625, %v137_v13  ;;  %v86_v16 = vpop.f32.mrb[1].mxu0  ;;  %v139_v17 = vpop.f32.mrb[1].mxu1 }
  0xe1   :  { %v87_v18 = vpop.f32.mrb[2].mxu0  ;;  %v140_v19 = vpop.f32.mrb[2].mxu1 }
  0xe2   :  { %v88_v21 = vpop.f32.mrb[3].mxu0  ;;  %v141_v22 = vpop.f32.mrb[3].mxu1  ;;  %640 = vmatprep.subr.mxu0 %v90_v14  ;;  %645 = vmatprep.subr.mxu1 %v143_v15 }
  0xe3   :  { %641 = vmatpush3.msra.mxu0 %v90_v14  ;;  %646 = vmatpush3.msra.mxu1 %v143_v15 }
  0xe4   :  { %643 = vmatmul.mubr.msk.f32.vlgmr.msra.gmra.mrb[4].mxu0 %vm158_vm0, %v145_v20  ;;  %648 = vmatmul.mubr.msk.f32.vlgmr.msra.gmra.mrb[4].mxu1 %vm158_vm0, %v145_v20 }
  0xe5   :  { %664 = vmatprep.subr.bf16.mxu0 %v716_v23  ;;  %667 = vmatprep.subr.bf16.mxu1 %v716_v23 }
  0xe6   :  { %654 = vmatprep.mubr.msk.f32.mxu0 %vm717_vm1, %v718_v24  ;;  %661 = vmatprep.mubr.msk.f32.mxu1 %vm717_vm1, %v718_v24 }
 0x1b7   :  { %v644_v29 = vpop.f32.mrb[4].mxu0  ;;  %v649_v30 = vpop.f32.mrb[4].mxu1 }
 0x1b8   :  { %v237_v31 = vadd.f32 %v644_v29, %v156_v28  ;;  %v312_v32 = vadd.f32 %v649_v30, %v156_v28  ;;  %v231_v33 = vpop.f32.mrb[5].mxu0  ;;  %v306_v34 = vpop.f32.mrb[5].mxu1 }
 0x1b9   :  { %v232_v35 = vadd.f32 %v231_v33, %v151_v27  ;;  %v307_v36 = vadd.f32 %v306_v34, %v151_v27 }
 0x1ba   :  { %v316_v37 = vadd.f32 3.0, %v237_v31  ;;  %v326_v38 = vadd.f32 3.0, %v312_v32 }
 0x1bb   :  { %v315_v39 = vadd.f32 3.0, %v232_v35  ;;  %v325_v40 = vadd.f32 3.0, %v307_v36 }
 0x1bc   :  { %v318_v41 = vmax.f32 %v316_v37, 0.0  ;;  %v328_v42 = vmax.f32 %v326_v38, 0.0 }
 0x1bd   :  { %v317_v43 = vmax.f32 %v315_v39, 0.0  ;;  %v327_v44 = vmax.f32 %v325_v40, 0.0 }
 0x1be   :  { %v320_v45 = vmin.f32 %v318_v41, 6.0  ;;  %v330_v46 = vmin.f32 %v328_v42, 6.0 }
 0x1bf   :  { %v319_v47 = vmin.f32 %v317_v43, 6.0  ;;  %v329_v48 = vmin.f32 %v327_v44, 6.0 }
 0x1c0   :  { %v322_v49 = vmul.f32 0.16666667, %v320_v45  ;;  %v332_v50 = vmul.f32 0.16666667, %v330_v46 }
 0x1c1   :  { %v321_v51 = vmul.f32 0.16666667, %v319_v47  ;;  %v331_v52 = vmul.f32 0.16666667, %v329_v48 }
 0x1c2   :  { %v324_v53 = vmul.f32 %v322_v49, %v237_v31  ;;  %v334_v54 = vmul.f32 %v332_v50, %v312_v32 }
 0x1c3   :  { %v323_v55 = vmul.f32 %v321_v51, %v232_v35  ;;  %v333_v56 = vmul.f32 %v331_v52, %v307_v36 }
 0x1c5   :  { %v665_v57 = vpack.c.bf16 %v324_v53, %v323_v55  ;;  %v668_v58 = vpack.c.bf16 %v334_v54, %v333_v56 }
 0x1c7   :  { %666 = vmatpush3.bf16.msra.mxu0 %v665_v57  ;;  %669 = vmatpush3.bf16.msra.mxu1 %v668_v58 }
 0x1c8   :  { %510 = vmatprep.subr.bf16.mxu0 %v773_v0  ;;  %555 = vmatprep.subr.bf16.mxu1 %v778_v1 }
 0x1ca   :  { %655 = vmatmul.mubr.msk.f32.vlgmr.msra.gmra.mrb[6].mxu0 %vm342_vm2, %v335_v59  ;;  %662 = vmatmul.mubr.msk.f32.vlgmr.msra.gmra.mrb[6].mxu1 %vm342_vm2, %v416_v60 }
 0x1cb   :  { %511 = vmatpush1.bf16.msra.mxu0 %v784_v2  ;;  %556 = vmatpush1.bf16.msra.mxu1 %v789_v3 }
 0x1cc   :  { %542 = vmatprep.mubr.bf16.mxu0 %v715_v10  ;;  %587 = vmatprep.mubr.bf16.mxu1 %v715_v10 }
 0x29d   :  { %v412_v63 = vpop.f32.mrb[6].mxu0  ;;  %v492_v5 = vpop.f32.mrb[6].mxu1 }
 0x29e   :  { %v413_v7 = vadd.f32 %v412_v63, %v340_v61  ;;  %v493_v0 = vadd.f32 %v492_v5, %v421_v62  ;;  %v656_v8 = vpop.f32.mrb[7].mxu0  ;;  %v663_v1 = vpop.f32.mrb[7].mxu1 }
 0x2a0   :  { %v496_v9 = vsub.f32 0.0, %v413_v7  ;;  %v501_v11 = vsub.f32 0.0, %v493_v0 }
 0x2a2   :  { %v497_v12 = vmul.f32 1.442695, %v496_v9  ;;  %v502_v13 = vmul.f32 1.442695, %v501_v11 }
 0x2a4   :  { %683 = vpow2.f32 %v497_v12 }
 0x2a5   :  { %685 = vpow2.f32 %v502_v13 }
 0x2ae   :  { %v684_v2 = vpop.eup %683 }
 0x2af   :  { %v686_v3 = vpop.eup %685  ;;  %v499_v14 = vadd.f32 1.0, %v684_v2 }
 0x2b0   :  { %v504_v15 = vadd.f32 1.0, %v686_v3 }
 0x2b1   :  { %687 = vrcp.f32 %v499_v14 }
 0x2b2   :  { %689 = vrcp.f32 %v504_v15 }
 0x2bb   :  { %v688_v10 = vpop.eup %687 }
 0x2bc   :  { %v690_v16 = vpop.eup %689  ;;  %v506_v17 = vpack.c.bf16 %v688_v10, %v688_v10 }
 0x2bd   :  { %v551_v18 = vpack.c.bf16 %v690_v16, %v690_v16 }
 0x2be   :  { %626 = vmatmul.mubr.msk.bf16.vlgmr.msra.gmra.mrb[8].mxu0 %vm342_vm2, %v506_v17 }
 0x2bf   :  { %627 = vmatmul.mubr.msk.bf16.vlgmr.msra.gmra.mrb[8].mxu1 %vm342_vm2, %v551_v18 }
 0x391   :  { %v544_v19 = vpop.f32.mrb[8].mxu0 }
 0x392   :  { %v596_v20 = vmul.f32 %v544_v19, %v804_v6  ;;  %v589_v21 = vpop.f32.mrb[8].mxu1  ;;  %v546_v22 = vpop.f32.mrb[9].mxu0 }
 0x393   :  { %v597_v23 = vmul.f32 %v546_v22, %v794_v4  ;;  %v591_v24 = vpop.f32.mrb[9].mxu1  ;;  %v548_v25 = vpop.f32.mrb[10].mxu0 }
 0x394   :  { %v598_v26 = vmul.f32 %v596_v20, %v589_v21  ;;  %v593_v27 = vpop.f32.mrb[10].mxu1  ;;  %v549_v28 = vpop.f32.mrb[11].mxu0 }
 0x395   :  { %v599_v29 = vmul.f32 %v597_v23, %v591_v24  ;;  %v594_v30 = vpop.f32.mrb[11].mxu1 }
 0x396   :  { %600 = vst [vmem:[#allocation2] sm:$0xff] %v598_v26 }
 0x397   :  { %601 = vst [vmem:[#allocation2 + $0x8] sm:$0xff] %v599_v29 }
 0x398   :  { %702 = shalt.err (!%p699_p4)
}
 0x399   :  { %s703_s12 = scalar_lea.hbm %s871_s9, 256 }
 0x39a   :  { %p704_p5 = scmp.ne.s32.totalorder %s871_s9, %s703_s12  ;;  %p707_p6 = scmp.lt.u32.totalorder %s703_s12, %s871_s9 }
 0x39c   :  { %p709_p7 = pnand %p707_p6, %p704_p5 }
 0x39e   :  { %712 = shalt.err (!%p709_p7)
}
 0x39f   :  { %611 = dma.vmem_to_hbm [thread:$0]  %s609_s7, 256, %s871_s9, [#allocation3]  }
 0x3a0   :  { %713 = dma.done.wait [#allocation3], 256  }
 0x3a1   :  { %714 = vsyncadd [#allocation3], 4294967040 }
 0x3a2   :  { %615 = vsyncpa [#allocation3], 1 }

// kernel: tpu_custom_call.1
= control target key start
LH: loop header
LB: loop body
LE: loop exit
PB: predicated region body
PF: predicated region fallthrough
CT: control target
= control target key end

     0   :  { %s862_s0 = inlined_call_operand.vmem [shape: f32[8,256], index: 0, kind: input, shape index: {}]   ;;  %s863_s1 = inlined_call_operand.vmem [shape: bf16[16,256], index: 1, kind: input, shape index: {}]   ;;  %s864_s2 = inlined_call_operand.vmem [shape: bf16[16,256], index: 2, kind: input, shape index: {}]   ;;  %s865_s3 = inlined_call_operand.vmem [shape: f32[16,8], index: 3, kind: input, shape index: {}]   ;;  %s866_s4 = inlined_call_operand.vmem [shape: f32[16,1], index: 4, kind: input, shape index: {}]   ;;  %s867_s5 = inlined_call_operand.vmem [shape: f32[8,16], index: 5, kind: input, shape index: {}]   ;;  %s868_s6 = inlined_call_operand.vmem [shape: f32[8,1], index: 6, kind: input, shape index: {}]   ;;  %s869_s7 = inlined_call_operand.vmem [shape: f32[8,16], index: 7, kind: input, shape index: {}]   ;;  %s870_s8 = inlined_call_operand.vmem [shape: f32[8,1], index: 8, kind: input, shape index: {}]   ;;  %s871_s9 = inlined_call_operand.hbm [shape: f32[8,256], index: 9, kind: output, shape index: {}]  }
   0x1   :  { %v773_v0 = vld [vmem:[%s863_s1 + $0x4] ss:$8 sps:$4 sm:$0xff]   ;;  %v784_v2 = vld [vmem:[%s863_s1] ss:$8 sps:$4 sm:$0xff]  }
   0x2   :  { %v778_v1 = vld [vmem:[%s864_s2 + $0x4] ss:$8 sps:$4 sm:$0xff]   ;;  %50 = vmatprep.subr.bf16.mxu0 %v773_v0  ;;  %v789_v3 = vld [vmem:[%s864_s2] ss:$8 sps:$4 sm:$0xff]  }
   0x3   :  { %v794_v4 = vld [vmem:[%s862_s0 + $0x8] sm:$0xff]  ;;  %103 = vmatprep.subr.bf16.mxu1 %v778_v1 }
   0x4   :  { %v37_v5 = vpack.c.bf16 %v794_v4, %v794_v4 }
   0x5   :  { %14 = vsyncpa [#allocation3], 0  ;;  %51 = vmatpush1.bf16.xpose.msra.mxu0 %v784_v2  ;;  %104 = vmatpush1.bf16.xpose.msra.mxu1 %v789_v3  ;;  %v804_v6 = vld [vmem:[%s862_s0] sm:$0xff]  ;;  %vm158_vm0 = vcmask 64512   ;;  %v715_v10 = vmov 0   ;;  %v147_v11 = vld [vmem:[%s866_s4 + $0x8] sm:$0xff] }
   0x6   :  { %82 = vmatprep.mubr.bf16.mxu0 %v37_v5  ;;  %135 = vmatprep.mubr.bf16.mxu1 %v37_v5  ;;  %v36_v7 = vpack.c.bf16 %v804_v6, %v804_v6  ;;  %v144_v8 = vld [vmem:[%s865_s3] sm:$0xff]  ;;  %v145_v20 = vld [vmem:[%s865_s3 + $0x8] sm:$0xff]  ;;  %v716_v23 = vmov 0.0|0.0   ;;  %vm717_vm1 = vmmov 0   ;;  %v718_v24 = vmov 0.0  }
   0x7   :  { %v146_v9 = vld [vmem:[%s866_s4] sm:$0xff]  ;;  %675 = vset.pattern.permute.xlu0 %v715_v10  ;;  %676 = vset.pattern.permute.xlu1 %v715_v10  ;;  %vm342_vm2 = vcmask 130048  }
   0x8   :  { %150 = vperm.xlu0 %675, %v146_v9   ;;  %v336_v25 = vld [vmem:[%s868_s6] sm:$0xff] }
   0x9   :  { %339 = vperm.xlu1 %676, %v336_v25   ;;  %v417_v26 = vld [vmem:[%s870_s8] sm:$0xff] }
   0xa   :  { %v335_v59 = vld [vmem:[%s867_s5] sm:$0xff]  ;;  %s719_s5 = smov [#allocation2]  }
   0xb   :  { %v416_v60 = vld [vmem:[%s869_s7] sm:$0xff]  ;;  %s608_s7 = sshll.u32 %s719_s5, 4  ;;  %s609_s7 = int_to_ptr.vmem [resolvable:$true] %s608_s7 }
   0xc   :  { %83 = vmatmul.mubr.bf16.vlgmr.msra.gmra.mrb[0].mxu0 %v36_v7  ;;  %136 = vmatmul.mubr.bf16.vlgmr.msra.gmra.mrb[0].mxu1 %v36_v7  ;;  %s691_s30 = scalar_lea.vmem %s609_s7, 256  ;;  %p696_p1 = scmp.lt.s32.totalorder %s609_s7, %s609_s7 }
   0xd   :  { %642 = vmatprep.mubr.msk.f32.mxu0 %vm158_vm0, %v144_v8  ;;  %647 = vmatprep.mubr.msk.f32.mxu1 %vm158_vm0, %v144_v8  ;;  %p692_p0 = scmp.ne.s32.totalorder %s609_s7, %s691_s30  ;;  %p697_p2 = scmp.lt.s32.totalorder %s691_s30, %s691_s30 }
   0xe   :  { %155 = vperm.xlu0 %675, %v147_v11   ;;  %420 = vperm.xlu1 %676, %v417_v26  }
   0xf   :  { %p698_p3 = por %p697_p2, %p696_p1 }
  0x11   :  { %p699_p4 = pnand %p698_p3, %p692_p0 }
  0x87   :  { %v151_v27 = vpop.permute.xlu0 %150 }
  0x88   :  { %v340_v61 = vpop.permute.xlu1 %339 }
  0x8d   :  { %v156_v28 = vpop.permute.xlu0 %155  ;;  %v421_v62 = vpop.permute.xlu1 %420 }
  0xdf   :  { %v84_v12 = vpop.f32.mrb[0].mxu0  ;;  %v137_v13 = vpop.f32.mrb[0].mxu1 }
  0xe0   :  { %v90_v14 = vmul.f32 0.0625, %v84_v12  ;;  %v143_v15 = vmul.f32 0.0625, %v137_v13  ;;  %v86_v16 = vpop.f32.mrb[1].mxu0  ;;  %v139_v17 = vpop.f32.mrb[1].mxu1 }
  0xe1   :  { %v87_v18 = vpop.f32.mrb[2].mxu0  ;;  %v140_v19 = vpop.f32.mrb[2].mxu1 }
  0xe2   :  { %v88_v21 = vpop.f32.mrb[3].mxu0  ;;  %v141_v22 = vpop.f32.mrb[3].mxu1  ;;  %640 = vmatprep.subr.mxu0 %v90_v14  ;;  %645 = vmatprep.subr.mxu1 %v143_v15 }
  0xe3   :  { %641 = vmatpush3.msra.mxu0 %v90_v14  ;;  %646 = vmatpush3.msra.mxu1 %v143_v15 }
  0xe4   :  { %643 = vmatmul.mubr.msk.f32.vlgmr.msra.gmra.mrb[4].mxu0 %vm158_vm0, %v145_v20  ;;  %648 = vmatmul.mubr.msk.f32.vlgmr.msra.gmra.mrb[4].mxu1 %vm158_vm0, %v145_v20 }
  0xe5   :  { %664 = vmatprep.subr.bf16.mxu0 %v716_v23  ;;  %667 = vmatprep.subr.bf16.mxu1 %v716_v23 }
  0xe6   :  { %654 = vmatprep.mubr.msk.f32.mxu0 %vm717_vm1, %v718_v24  ;;  %661 = vmatprep.mubr.msk.f32.mxu1 %vm717_vm1, %v718_v24 }
 0x1b7   :  { %v644_v29 = vpop.f32.mrb[4].mxu0  ;;  %v649_v30 = vpop.f32.mrb[4].mxu1 }
 0x1b8   :  { %v237_v31 = vadd.f32 %v644_v29, %v156_v28  ;;  %v312_v32 = vadd.f32 %v649_v30, %v156_v28  ;;  %v231_v33 = vpop.f32.mrb[5].mxu0  ;;  %v306_v34 = vpop.f32.mrb[5].mxu1 }
 0x1b9   :  { %v232_v35 = vadd.f32 %v231_v33, %v151_v27  ;;  %v307_v36 = vadd.f32 %v306_v34, %v151_v27 }
 0x1ba   :  { %v316_v37 = vadd.f32 3.0, %v237_v31  ;;  %v326_v38 = vadd.f32 3.0, %v312_v32 }
 0x1bb   :  { %v315_v39 = vadd.f32 3.0, %v232_v35  ;;  %v325_v40 = vadd.f32 3.0, %v307_v36 }
 0x1bc   :  { %v318_v41 = vmax.f32 %v316_v37, 0.0  ;;  %v328_v42 = vmax.f32 %v326_v38, 0.0 }
 0x1bd   :  { %v317_v43 = vmax.f32 %v315_v39, 0.0  ;;  %v327_v44 = vmax.f32 %v325_v40, 0.0 }
 0x1be   :  { %v320_v45 = vmin.f32 %v318_v41, 6.0  ;;  %v330_v46 = vmin.f32 %v328_v42, 6.0 }
 0x1bf   :  { %v319_v47 = vmin.f32 %v317_v43, 6.0  ;;  %v329_v48 = vmin.f32 %v327_v44, 6.0 }
 0x1c0   :  { %v322_v49 = vmul.f32 0.16666667, %v320_v45  ;;  %v332_v50 = vmul.f32 0.16666667, %v330_v46 }
 0x1c1   :  { %v321_v51 = vmul.f32 0.16666667, %v319_v47  ;;  %v331_v52 = vmul.f32 0.16666667, %v329_v48 }
 0x1c2   :  { %v324_v53 = vmul.f32 %v322_v49, %v237_v31  ;;  %v334_v54 = vmul.f32 %v332_v50, %v312_v32 }
 0x1c3   :  { %v323_v55 = vmul.f32 %v321_v51, %v232_v35  ;;  %v333_v56 = vmul.f32 %v331_v52, %v307_v36 }
 0x1c5   :  { %v665_v57 = vpack.c.bf16 %v324_v53, %v323_v55  ;;  %v668_v58 = vpack.c.bf16 %v334_v54, %v333_v56 }
 0x1c7   :  { %666 = vmatpush3.bf16.msra.mxu0 %v665_v57  ;;  %669 = vmatpush3.bf16.msra.mxu1 %v668_v58 }
 0x1c8   :  { %510 = vmatprep.subr.bf16.mxu0 %v773_v0  ;;  %555 = vmatprep.subr.bf16.mxu1 %v778_v1 }
 0x1ca   :  { %655 = vmatmul.mubr.msk.f32.vlgmr.msra.gmra.mrb[6].mxu0 %vm342_vm2, %v335_v59  ;;  %662 = vmatmul.mubr.msk.f32.vlgmr.msra.gmra.mrb[6].mxu1 %vm342_vm2, %v416_v60 }
 0x1cb   :  { %511 = vmatpush1.bf16.msra.mxu0 %v784_v2  ;;  %556 = vmatpush1.bf16.msra.mxu1 %v789_v3 }
 0x1cc   :  { %542 = vmatprep.mubr.bf16.mxu0 %v715_v10  ;;  %587 = vmatprep.mubr.bf16.mxu1 %v715_v10 }
 0x29d   :  { %v412_v63 = vpop.f32.mrb[6].mxu0  ;;  %v492_v5 = vpop.f32.mrb[6].mxu1 }
 0x29e   :  { %v413_v7 = vadd.f32 %v412_v63, %v340_v61  ;;  %v493_v0 = vadd.f32 %v492_v5, %v421_v62  ;;  %v656_v8 = vpop.f32.mrb[7].mxu0  ;;  %v663_v1 = vpop.f32.mrb[7].mxu1 }
 0x2a0   :  { %v496_v9 = vsub.f32 0.0, %v413_v7  ;;  %v501_v11 = vsub.f32 0.0, %v493_v0 }
 0x2a2   :  { %v497_v12 = vmul.f32 1.442695, %v496_v9  ;;  %v502_v13 = vmul.f32 1.442695, %v501_v11 }
 0x2a4   :  { %683 = vpow2.f32 %v497_v12 }
 0x2a5   :  { %685 = vpow2.f32 %v502_v13 }
 0x2ae   :  { %v684_v2 = vpop.eup %683 }
 0x2af   :  { %v686_v3 = vpop.eup %685  ;;  %v499_v14 = vadd.f32 1.0, %v684_v2 }
 0x2b0   :  { %v504_v15 = vadd.f32 1.0, %v686_v3 }
 0x2b1   :  { %687 = vrcp.f32 %v499_v14 }
 0x2b2   :  { %689 = vrcp.f32 %v504_v15 }
 0x2bb   :  { %v688_v10 = vpop.eup %687 }
 0x2bc   :  { %v690_v16 = vpop.eup %689  ;;  %v506_v17 = vpack.c.bf16 %v688_v10, %v688_v10 }
 0x2bd   :  { %v551_v18 = vpack.c.bf16 %v690_v16, %v690_v16 }
 0x2be   :  { %626 = vmatmul.mubr.msk.bf16.vlgmr.msra.gmra.mrb[8].mxu0 %vm342_vm2, %v506_v17 }
 0x2bf   :  { %627 = vmatmul.mubr.msk.bf16.vlgmr.msra.gmra.mrb[8].mxu1 %vm342_vm2, %v551_v18 }
 0x391   :  { %v544_v19 = vpop.f32.mrb[8].mxu0 }
 0x392   :  { %v596_v20 = vmul.f32 %v544_v19, %v804_v6  ;;  %v589_v21 = vpop.f32.mrb[8].mxu1  ;;  %v546_v22 = vpop.f32.mrb[9].mxu0 }
 0x393   :  { %v597_v23 = vmul.f32 %v546_v22, %v794_v4  ;;  %v591_v24 = vpop.f32.mrb[9].mxu1  ;;  %v548_v25 = vpop.f32.mrb[10].mxu0 }
 0x394   :  { %v598_v26 = vmul.f32 %v596_v20, %v589_v21  ;;  %v593_v27 = vpop.f32.mrb[10].mxu1  ;;  %v549_v28 = vpop.f32.mrb[11].mxu0 }
 0x395   :  { %v599_v29 = vmul.f32 %v597_v23, %v591_v24  ;;  %v594_v30 = vpop.f32.mrb[11].mxu1 }
 0x396   :  { %600 = vst [vmem:[#allocation2] sm:$0xff] %v598_v26 }
 0x397   :  { %601 = vst [vmem:[#allocation2 + $0x8] sm:$0xff] %v599_v29 }
 0x398   :  { %702 = shalt.err (!%p699_p4)
}
 0x399   :  { %s703_s12 = scalar_lea.hbm %s871_s9, 256 }
 0x39a   :  { %p704_p5 = scmp.ne.s32.totalorder %s871_s9, %s703_s12  ;;  %p707_p6 = scmp.lt.u32.totalorder %s703_s12, %s871_s9 }
 0x39c   :  { %p709_p7 = pnand %p707_p6, %p704_p5 }
 0x39e   :  { %712 = shalt.err (!%p709_p7)
}
 0x39f   :  { %611 = dma.vmem_to_hbm [thread:$0]  %s609_s7, 256, %s871_s9, [#allocation3]  }
 0x3a0   :  { %713 = dma.done.wait [#allocation3], 256  }
 0x3a1   :  { %714 = vsyncadd [#allocation3], 4294967040 }
 0x3a2   :  { %615 = vsyncpa [#allocation3], 1 }

</bundles_post_ra>
